<compile_context>
chip_gen: v6e
topology: v6e:2x2x1
jax: 0.10.0
libtpu: 0.0.40
codegen_flags: <defaults>
</compile_context>

<pallas_src>
import jax
import jax.numpy as jnp
from jax.experimental import pallas as pl
from jax.experimental.pallas import tpu as pltpu


# ----------------------------- fused kernel --------------------------------- #

def ensemble_value_kernel(x_ref, tw_ref, tb_ref, g_ref, beta_ref,
                          w1_ref, b1_ref, w2_ref, b2_ref, w3_ref, b3_ref,
                          o_ref):
    # ---- trunk: Linear -> LayerNorm(eps=1e-5) -> tanh (all f32, VMEM-resident) ----
    h = jnp.dot(x_ref[...], tw_ref[...],
                preferred_element_type=jnp.float32) + tb_ref[...]
    mean = jnp.mean(h, axis=-1, keepdims=True)
    var = jnp.mean(jnp.square(h - mean), axis=-1, keepdims=True)
    s = jnp.tanh((h - mean) * jax.lax.rsqrt(var + 1e-5) * g_ref[...] + beta_ref[...])

    num_q = w2_ref.shape[0]
    hidden = w2_ref.shape[1]

    # ---- ensemble layer 1: ONE wide MXU push for all heads: (B,S) @ (S, Q*H) ----
    h1 = jnp.dot(s, w1_ref[...], preferred_element_type=jnp.float32) + b1_ref[...]
    h1 = jnp.maximum(h1, 0.0)

    # ---- layers 2 & 3 per head, statically unrolled (num_q is tiny) ----
    cols = []
    for q in range(num_q):
        hq = h1[:, q * hidden:(q + 1) * hidden]                      # (B, H) static slice
        h2 = jnp.dot(hq, w2_ref[q],
                     preferred_element_type=jnp.float32) + b2_ref[q]
        h2 = jnp.maximum(h2, 0.0)
        # out_dim == 1 head: VPU multiply + lane reduction (skip a 1-column MXU matmul)
        cols.append(jnp.sum(h2 * w3_ref[q], axis=-1, keepdims=True))  # (B, 1)

    # (B, num_q): trailing dim-1 squeezed in-kernel; bias row broadcast over sublanes.
    o_ref[...] = (jnp.concatenate(cols, axis=-1) + b3_ref[...]).astype(o_ref.dtype)


# ----------------------------- wrapper -------------------------------------- #

def ensemble_value_forward(x, params):
    """Forward equivalent to EnsembleValue.forward(state, mode=False, tanh=True)."""
    B, repr_dim = x.shape
    state_dim = params["trunk_w"].shape[1]
    num_q, _, hidden = params["w1"].shape
    out_dim = params["w3"].shape[2]
    # TODO(synk): output_dim > 1 would keep a (num_q, B, out_dim) matmul head; module default is 1.
    assert out_dim == 1, "kernel specialized for the module default output_dim=1"

    # One-time weight repack (constant-folds under jit; in production pre-pack once):
    #   w1: (Q, S, H) -> (S, Q*H) so layer 1 is a single wide dot.
    w1_wide = jnp.transpose(params["w1"], (1, 0, 2)).reshape(state_dim, num_q * hidden)
    b1_wide = params["b1"].reshape(1, num_q * hidden)
    #   w3: (Q, H, 1) -> (Q, 1, H) lane-dense rows for the VPU reduce; b3 -> (1, Q) row.
    w3_row = jnp.transpose(params["w3"], (0, 2, 1))
    b3_row = params["b3"].reshape(1, num_q)

    vmem = pl.BlockSpec(memory_space=pltpu.MemorySpace.VMEM)  # whole array, VMEM-resident
    v_bq = pl.pallas_call(
        ensemble_value_kernel,
        out_shape=jax.ShapeDtypeStruct((B, num_q), jnp.float32),
        in_specs=[vmem] * 11,
        out_specs=vmem,
        # no grid: single fused invocation, all weights + activations (~25 KB) in VMEM
    )(x, params["trunk_w"], params["trunk_b"], params["ln_g"], params["ln_b"],
      w1_wide, b1_wide, params["w2"], params["b2"], w3_row, b3_row)

    v = v_bq.T                      # (num_q, B); squeeze(-1) already done in-kernel
    if num_q == 1:                  # output_v(mode=False) -> squeeze(0)
        v = jnp.squeeze(v, 0)
    return v


# ----------------------------- reference ------------------------------------ #

def ensemble_value_reference(x, params):
    h = x @ params["trunk_w"] + params["trunk_b"]
    mean = jnp.mean(h, axis=-1, keepdims=True)
    var = jnp.mean(jnp.square(h - mean), axis=-1, keepdims=True)
    h = (h - mean) * jax.lax.rsqrt(var + 1e-5) * params["ln_g"] + params["ln_b"]
    s = jnp.tanh(h)                                                   # (B, state_dim)
    h = jnp.maximum(jnp.einsum("bi,qio->qbo", s, params["w1"]) + params["b1"], 0.0)
    h = jnp.maximum(jnp.einsum("qbi,qio->qbo", h, params["w2"]) + params["b2"], 0.0)
    v = jnp.einsum("qbi,qio->qbo", h, params["w3"]) + params["b3"]    # (num_q, B, 1)
    return jnp.squeeze(v, -1)                                         # (num_q, B)


# ----------------------------- setup ---------------------------------------- #

def init_params(key, repr_dim, state_dim, hidden_dim, num_q, out_dim):
    # Deterministic synthetic init (stand-in for weight_init's orthogonal init).
    ks = jax.random.split(key, 8)
    def w(k, shape, fan_in):
        return (jax.random.normal(k, shape, jnp.float32) / jnp.sqrt(fan_in)).astype(jnp.float32)
    return {
        "trunk_w": w(ks[0], (repr_dim, state_dim), repr_dim),
        "trunk_b": jnp.zeros((1, state_dim), jnp.float32),
        "ln_g": jnp.ones((1, state_dim), jnp.float32),
        "ln_b": jnp.zeros((1, state_dim), jnp.float32),
        "w1": w(ks[1], (num_q, state_dim, hidden_dim), state_dim),
        "b1": 0.01 * jax.random.normal(ks[2], (num_q, 1, hidden_dim), jnp.float32),
        "w2": w(ks[3], (num_q, hidden_dim, hidden_dim), hidden_dim),
        "b2": 0.01 * jax.random.normal(ks[4], (num_q, 1, hidden_dim), jnp.float32),
        "w3": w(ks[5], (num_q, hidden_dim, out_dim), hidden_dim),
        "b3": 0.01 * jax.random.normal(ks[6], (num_q, 1, out_dim), jnp.float32),
    }


if __name__ == "__main__":
    # Module hyperparams: hidden_dim=32, repr_dim=64, encoder_feature_dim=32, l=2, num_q=2, output_dim=1
    B, repr_dim, state_dim, hidden_dim, num_q, out_dim = 8, 64, 32, 32, 2, 1

    key = jax.random.PRNGKey(0)
    kx, kp = jax.random.split(key)
    x = jax.random.normal(kx, (B, repr_dim), jnp.float32)
    params = init_params(kp, repr_dim, state_dim, hidden_dim, num_q, out_dim)

    fwd = jax.jit(ensemble_value_forward)
    v = jax.block_until_ready(fwd(x, params))                      # (num_q, B)
    v_ref = jax.block_until_ready(ensemble_value_reference(x, params))

    assert v.shape == (num_q, B), v.shape
    assert jnp.allclose(v, v_ref, atol=2e-3, rtol=2e-3), (v, v_ref)
    print("KERNEL_OK")
</pallas_src>

<mosaic_0001>
module attributes {stable_mosaic.version = 11 : i64} {
  func.func @ensemble_value_kernel(%arg0: memref<8x64xf32, #tpu.memory_space<vmem>>, %arg1: memref<64x32xf32, #tpu.memory_space<vmem>>, %arg2: memref<1x32xf32, #tpu.memory_space<vmem>>, %arg3: memref<1x32xf32, #tpu.memory_space<vmem>>, %arg4: memref<1x32xf32, #tpu.memory_space<vmem>>, %arg5: memref<32x64xf32, #tpu.memory_space<vmem>>, %arg6: memref<1x64xf32, #tpu.memory_space<vmem>>, %arg7: memref<2x32x32xf32, #tpu.memory_space<vmem>>, %arg8: memref<2x1x32xf32, #tpu.memory_space<vmem>>, %arg9: memref<2x1x32xf32, #tpu.memory_space<vmem>>, %arg10: memref<1x2xf32, #tpu.memory_space<vmem>>, %arg11: memref<8x2xf32, #tpu.memory_space<vmem>>) attributes {dimension_semantics = [], scalar_prefetch = 0 : i64, scratch_operands = 0 : i64, tpu.core_type = #tpu.core_type<tc>} {
    %c0 = arith.constant 0 : index
    %c0_0 = arith.constant 0 : index
    %0 = vector.load %arg0[%c0, %c0_0] : memref<8x64xf32, #tpu.memory_space<vmem>>, vector<8x64xf32>
    %c0_1 = arith.constant 0 : index
    %c0_2 = arith.constant 0 : index
    %1 = vector.load %arg1[%c0_1, %c0_2] : memref<64x32xf32, #tpu.memory_space<vmem>>, vector<64x32xf32>
    %cst = arith.constant dense<0.000000e+00> : vector<8x32xf32>
    %2 = tpu.matmul %0, %1, %cst {dimension_numbers = #tpu.dot_dimension_numbers<[1], [0], [0], [1], [0, 0, 1, 1], [], []>} : vector<8x64xf32>, vector<64x32xf32>, vector<8x32xf32> -> vector<8x32xf32>
    %c0_3 = arith.constant 0 : index
    %c0_4 = arith.constant 0 : index
    %3 = vector.load %arg2[%c0_3, %c0_4] : memref<1x32xf32, #tpu.memory_space<vmem>>, vector<1x32xf32>
    %4 = vector.broadcast %3 : vector<1x32xf32> to vector<8x32xf32>
    %5 = arith.addf %2, %4 : vector<8x32xf32>
    %cst_5 = arith.constant dense<0.000000e+00> : vector<8xf32>
    %6 = vector.multi_reduction <add>, %5, %cst_5 [1] : vector<8x32xf32> to vector<8xf32>
    %7 = vector.shape_cast %6 : vector<8xf32> to vector<8x1xf32>
    %cst_6 = arith.constant 3.200000e+01 : f32
    %8 = vector.broadcast %cst_6 : f32 to vector<8x1xf32>
    %9 = arith.divf %7, %8 : vector<8x1xf32>
    %10 = vector.broadcast %9 : vector<8x1xf32> to vector<8x32xf32>
    %11 = arith.subf %5, %10 : vector<8x32xf32>
    %12 = arith.mulf %11, %11 : vector<8x32xf32>
    %cst_7 = arith.constant dense<0.000000e+00> : vector<8xf32>
    %13 = vector.multi_reduction <add>, %12, %cst_7 [1] : vector<8x32xf32> to vector<8xf32>
    %14 = vector.shape_cast %13 : vector<8xf32> to vector<8x1xf32>
    %cst_8 = arith.constant 3.200000e+01 : f32
    %15 = vector.broadcast %cst_8 : f32 to vector<8x1xf32>
    %16 = arith.divf %14, %15 : vector<8x1xf32>
    %17 = vector.broadcast %9 : vector<8x1xf32> to vector<8x32xf32>
    %18 = arith.subf %5, %17 : vector<8x32xf32>
    %cst_9 = arith.constant 9.99999974E-6 : f32
    %19 = vector.broadcast %cst_9 : f32 to vector<8x1xf32>
    %20 = arith.addf %16, %19 : vector<8x1xf32>
    %21 = math.rsqrt %20 : vector<8x1xf32>
    %22 = vector.broadcast %21 : vector<8x1xf32> to vector<8x32xf32>
    %23 = arith.mulf %18, %22 : vector<8x32xf32>
    %c0_10 = arith.constant 0 : index
    %c0_11 = arith.constant 0 : index
    %24 = vector.load %arg3[%c0_10, %c0_11] : memref<1x32xf32, #tpu.memory_space<vmem>>, vector<1x32xf32>
    %25 = vector.broadcast %24 : vector<1x32xf32> to vector<8x32xf32>
    %26 = arith.mulf %23, %25 : vector<8x32xf32>
    %c0_12 = arith.constant 0 : index
    %c0_13 = arith.constant 0 : index
    %27 = vector.load %arg4[%c0_12, %c0_13] : memref<1x32xf32, #tpu.memory_space<vmem>>, vector<1x32xf32>
    %28 = vector.broadcast %27 : vector<1x32xf32> to vector<8x32xf32>
    %29 = arith.addf %26, %28 : vector<8x32xf32>
    %30 = math.tanh %29 : vector<8x32xf32>
    %c0_14 = arith.constant 0 : index
    %c0_15 = arith.constant 0 : index
    %31 = vector.load %arg5[%c0_14, %c0_15] : memref<32x64xf32, #tpu.memory_space<vmem>>, vector<32x64xf32>
    %cst_16 = arith.constant dense<0.000000e+00> : vector<8x64xf32>
    %32 = tpu.matmul %30, %31, %cst_16 {dimension_numbers = #tpu.dot_dimension_numbers<[1], [0], [0], [1], [0, 0, 1, 1], [], []>} : vector<8x32xf32>, vector<32x64xf32>, vector<8x64xf32> -> vector<8x64xf32>
    %c0_17 = arith.constant 0 : index
    %c0_18 = arith.constant 0 : index
    %33 = vector.load %arg6[%c0_17, %c0_18] : memref<1x64xf32, #tpu.memory_space<vmem>>, vector<1x64xf32>
    %34 = vector.broadcast %33 : vector<1x64xf32> to vector<8x64xf32>
    %35 = arith.addf %32, %34 : vector<8x64xf32>
    %cst_19 = arith.constant 0.000000e+00 : f32
    %36 = vector.broadcast %cst_19 : f32 to vector<8x64xf32>
    %37 = arith.maximumf %35, %36 : vector<8x64xf32>
    %38 = vector.extract_strided_slice %37 {offsets = [0, 0], sizes = [8, 32], strides = [1, 1]} : vector<8x64xf32> to vector<8x32xf32>
    %c0_20 = arith.constant 0 : index
    %c0_21 = arith.constant 0 : index
    %c0_22 = arith.constant 0 : index
    %39 = vector.load %arg7[%c0_20, %c0_21, %c0_22] : memref<2x32x32xf32, #tpu.memory_space<vmem>>, vector<1x32x32xf32>
    %40 = vector.shape_cast %39 : vector<1x32x32xf32> to vector<32x32xf32>
    %cst_23 = arith.constant dense<0.000000e+00> : vector<8x32xf32>
    %41 = tpu.matmul %38, %40, %cst_23 {dimension_numbers = #tpu.dot_dimension_numbers<[1], [0], [0], [1], [0, 0, 1, 1], [], []>} : vector<8x32xf32>, vector<32x32xf32>, vector<8x32xf32> -> vector<8x32xf32>
    %c0_24 = arith.constant 0 : index
    %c0_25 = arith.constant 0 : index
    %c0_26 = arith.constant 0 : index
    %42 = vector.load %arg8[%c0_24, %c0_25, %c0_26] : memref<2x1x32xf32, #tpu.memory_space<vmem>>, vector<1x1x32xf32>
    %43 = vector.shape_cast %42 : vector<1x1x32xf32> to vector<1x32xf32>
    %44 = vector.broadcast %43 : vector<1x32xf32> to vector<8x32xf32>
    %45 = arith.addf %41, %44 : vector<8x32xf32>
    %cst_27 = arith.constant 0.000000e+00 : f32
    %46 = vector.broadcast %cst_27 : f32 to vector<8x32xf32>
    %47 = arith.maximumf %45, %46 : vector<8x32xf32>
    %c0_28 = arith.constant 0 : index
    %c0_29 = arith.constant 0 : index
    %c0_30 = arith.constant 0 : index
    %48 = vector.load %arg9[%c0_28, %c0_29, %c0_30] : memref<2x1x32xf32, #tpu.memory_space<vmem>>, vector<1x1x32xf32>
    %49 = vector.shape_cast %48 : vector<1x1x32xf32> to vector<1x32xf32>
    %50 = vector.broadcast %49 : vector<1x32xf32> to vector<8x32xf32>
    %51 = arith.mulf %47, %50 : vector<8x32xf32>
    %cst_31 = arith.constant dense<0.000000e+00> : vector<8xf32>
    %52 = vector.multi_reduction <add>, %51, %cst_31 [1] : vector<8x32xf32> to vector<8xf32>
    %53 = vector.shape_cast %52 : vector<8xf32> to vector<8x1xf32>
    %54 = vector.extract_strided_slice %37 {offsets = [0, 32], sizes = [8, 32], strides = [1, 1]} : vector<8x64xf32> to vector<8x32xf32>
    %c1 = arith.constant 1 : index
    %c0_32 = arith.constant 0 : index
    %c0_33 = arith.constant 0 : index
    %55 = vector.load %arg7[%c1, %c0_32, %c0_33] : memref<2x32x32xf32, #tpu.memory_space<vmem>>, vector<1x32x32xf32>
    %56 = vector.shape_cast %55 : vector<1x32x32xf32> to vector<32x32xf32>
    %cst_34 = arith.constant dense<0.000000e+00> : vector<8x32xf32>
    %57 = tpu.matmul %54, %56, %cst_34 {dimension_numbers = #tpu.dot_dimension_numbers<[1], [0], [0], [1], [0, 0, 1, 1], [], []>} : vector<8x32xf32>, vector<32x32xf32>, vector<8x32xf32> -> vector<8x32xf32>
    %c1_35 = arith.constant 1 : index
    %c0_36 = arith.constant 0 : index
    %c0_37 = arith.constant 0 : index
    %58 = vector.load %arg8[%c1_35, %c0_36, %c0_37] : memref<2x1x32xf32, #tpu.memory_space<vmem>>, vector<1x1x32xf32>
    %59 = vector.shape_cast %58 : vector<1x1x32xf32> to vector<1x32xf32>
    %60 = vector.broadcast %59 : vector<1x32xf32> to vector<8x32xf32>
    %61 = arith.addf %57, %60 : vector<8x32xf32>
    %cst_38 = arith.constant 0.000000e+00 : f32
    %62 = vector.broadcast %cst_38 : f32 to vector<8x32xf32>
    %63 = arith.maximumf %61, %62 : vector<8x32xf32>
    %c1_39 = arith.constant 1 : index
    %c0_40 = arith.constant 0 : index
    %c0_41 = arith.constant 0 : index
    %64 = vector.load %arg9[%c1_39, %c0_40, %c0_41] : memref<2x1x32xf32, #tpu.memory_space<vmem>>, vector<1x1x32xf32>
    %65 = vector.shape_cast %64 : vector<1x1x32xf32> to vector<1x32xf32>
    %66 = vector.broadcast %65 : vector<1x32xf32> to vector<8x32xf32>
    %67 = arith.mulf %63, %66 : vector<8x32xf32>
    %cst_42 = arith.constant dense<0.000000e+00> : vector<8xf32>
    %68 = vector.multi_reduction <add>, %67, %cst_42 [1] : vector<8x32xf32> to vector<8xf32>
    %69 = vector.shape_cast %68 : vector<8xf32> to vector<8x1xf32>
    %70 = tpu.concatenate %53, %69 in 1 : vector<8x1xf32>, vector<8x1xf32> -> vector<8x2xf32>
    %c0_43 = arith.constant 0 : index
    %c0_44 = arith.constant 0 : index
    %71 = vector.load %arg10[%c0_43, %c0_44] : memref<1x2xf32, #tpu.memory_space<vmem>>, vector<1x2xf32>
    %72 = vector.broadcast %71 : vector<1x2xf32> to vector<8x2xf32>
    %73 = arith.addf %70, %72 : vector<8x2xf32>
    %c0_45 = arith.constant 0 : index
    %c0_46 = arith.constant 0 : index
    %74 = vector.load %arg11[%c0_45, %c0_46] : memref<8x2xf32, #tpu.memory_space<vmem>>, vector<8x2xf32>
    tpu.vector_store %arg11[%c0_45, %c0_46], %73 {strides = array<i32>} : memref<8x2xf32, #tpu.memory_space<vmem>>, vector<8x2xf32>,
    return
  }
}

</mosaic_0001>

<bundles_post_ra>
// kernel: ensemble_value_forward.1
= control target key start
LH: loop header
LB: loop body
LE: loop exit
PB: predicated region body
PF: predicated region fallthrough
CT: control target
= control target key end

     0   :  { %v559_v0 = vmov 0.0   ;;  %vm560_vm0 = vmmov 0   ;;  %vm54_vm1 = vcmask 523264   ;;  %vm128_vm2 = vcmask 261120   ;;  %s561_s20 = smov 96   ;;  %s750_s1 = inlined_call_operand.vmem [shape: f32[64,32], index: 1, kind: input, shape index: {}]   ;;  %s751_s0 = inlined_call_operand.vmem [shape: f32[8,64], index: 0, kind: input, shape index: {}]   ;;  %s752_s2 = inlined_call_operand.vmem [shape: f32[1,32], index: 2, kind: input, shape index: {}]   ;;  %s753_s5 = inlined_call_operand.vmem [shape: f32[32,64], index: 5, kind: input, shape index: {}]   ;;  %s754_s3 = inlined_call_operand.vmem [shape: f32[1,32], index: 3, kind: input, shape index: {}]   ;;  %s755_s4 = inlined_call_operand.vmem [shape: f32[1,32], index: 4, kind: input, shape index: {}]   ;;  %s756_s7 = inlined_call_operand.vmem [shape: f32[2,32,32], index: 7, kind: input, shape index: {}]   ;;  %s757_s6 = inlined_call_operand.vmem [shape: f32[1,64], index: 6, kind: input, shape index: {}]   ;;  %s758_s8 = inlined_call_operand.vmem [shape: f32[2,1,32], index: 8, kind: input, shape index: {}]   ;;  %s759_s9 = inlined_call_operand.vmem [shape: f32[2,1,32], index: 9, kind: input, shape index: {}]   ;;  %s760_s10 = inlined_call_operand.vmem [shape: f32[1,2], index: 10, kind: input, shape index: {}]   ;;  %s761_s11 = inlined_call_operand.vmem [shape: f32[8,2], index: 11, kind: output, shape index: {}]  }
   0x1   :  { %500 = vmatprep.subr.mxu0 %v559_v0  ;;  %v46_v1 = vld [vmem:[%s750_s1 + $0x38] sm:$0xff]  ;;  %v45_v2 = vld [vmem:[%s750_s1 + $0x30] sm:$0xff]  ;;  %516 = vmatprep.mubr.msk.f32.mxu0 %vm560_vm0, %v559_v0  ;;  %v44_v3 = vld [vmem:[%s750_s1 + $0x28] sm:$0xff]  ;;  %vm441_vm3 = vcmask 7168   ;;  %vm451_vm4 = vcmask 15360  }
   0x2   :  { %501 = vmatpush3.msra.mxu0 %v46_v1  ;;  %519 = vmatprep.subr.mxu1 %v559_v0  ;;  %v43_v4 = vld [vmem:[%s750_s1 + $0x20] sm:$0xff]  ;;  %v42_v5 = vld [vmem:[%s750_s1 + $0x18] sm:$0xff]  ;;  %v41_v6 = vld [vmem:[%s750_s1 + $0x10] sm:$0xff] }
   0x3   :  { %502 = vmatprep.subr.mxu0 %v559_v0  ;;  %527 = vmatprep.mubr.msk.f32.mxu1 %vm560_vm0, %v559_v0  ;;  %v40_v7 = vld [vmem:[%s750_s1 + $0x8] sm:$0xff]  ;;  %v39_v8 = vld [vmem:[%s750_s1] sm:$0xff]  ;;  %v163_v20 = vld [vmem:[%s753_s5 + $0x18] sm:$0xff] }
   0x4   :  { %503 = vmatpush3.msra.mxu0 %v45_v2  ;;  %v38_v9 = vld [vmem:[%s751_s0] sm:$0xff]  ;;  %v162_v21 = vld [vmem:[%s753_s5 + $0x10] sm:$0xff]  ;;  %520 = vmatpush3.msra.mxu1 %v163_v20  ;;  %v161_v22 = vld [vmem:[%s753_s5 + $0x8] sm:$0xff] }
   0x5   :  { %504 = vmatprep.subr.mxu0 %v559_v0  ;;  %v457_v10 = vld [vmem:[%s752_s2] ss:$0 sm:$0xff]  ;;  %521 = vmatprep.subr.mxu1 %v559_v0  ;;  %v248_v33 = vld [vmem:[%s756_s7 + $0x18] sm:$0xff]  ;;  %v247_v35 = vld [vmem:[%s756_s7 + $0x10] sm:$0xff] }
   0x6   :  { %505 = vmatpush3.msra.mxu0 %v44_v3  ;;  %522 = vmatpush3.msra.mxu1 %v162_v21  ;;  %v160_v23 = vld [vmem:[%s753_s5] sm:$0xff]  ;;  %v246_v36 = vld [vmem:[%s756_s7 + $0x8] sm:$0xff]  ;;  %v469_v38 = vld [vmem:[%s756_s7 + $0x38] sm:$0xff] }
   0x7   :  { %506 = vmatprep.subr.mxu0 %v559_v0  ;;  %523 = vmatprep.subr.mxu1 %v559_v0  ;;  %v459_v28 = vld [vmem:[%s754_s3] ss:$0 sm:$0xff]  ;;  %v468_v39 = vld [vmem:[%s756_s7 + $0x30] sm:$0xff]  ;;  %v467_v40 = vld [vmem:[%s756_s7 + $0x28] sm:$0xff] }
   0x8   :  { %507 = vmatpush3.msra.mxu0 %v43_v4  ;;  %524 = vmatpush3.msra.mxu1 %v161_v22  ;;  %v460_v30 = vld [vmem:[%s755_s4] ss:$0 sm:$0xff]  ;;  %v471_v56 = vld [vmem:[%s758_s8 + $0x1] ss:$0 sm:$0xff] }
   0x9   :  { %508 = vmatprep.subr.mxu0 %v559_v0  ;;  %525 = vmatprep.subr.mxu1 %v559_v0  ;;  %v245_v37 = vld [vmem:[%s756_s7] sm:$0xff] }
   0xa   :  { %509 = vmatpush3.msra.mxu0 %v42_v5  ;;  %526 = vmatpush3.msra.mxu1 %v160_v23  ;;  %v466_v41 = vld [vmem:[%s756_s7 + $0x20] sm:$0xff] }
   0xb   :  { %510 = vmatprep.subr.mxu0 %v559_v0  ;;  %530 = vmatprep.subr.mxu1 %v559_v0  ;;  %v461_v42 = vld [vmem:[%s757_s6] ss:$0 sm:$0xff]  ;;  %v474_v60 = vld [vmem:[%s759_s9 + $0x1] ss:$0 sm:$0xff] }
   0xc   :  { %511 = vmatpush3.msra.mxu0 %v41_v6  ;;  %v463_v48 = vld [vmem:[%s758_s8] ss:$0 sm:$0xff] }
   0xd   :  { %512 = vmatprep.subr.mxu0 %v559_v0  ;;  %v465_v52 = vld [vmem:[%s759_s9] ss:$0 sm:$0xff] }
   0xe   :  { %513 = vmatpush3.msra.mxu0 %v40_v7 }
   0xf   :  { %514 = vmatprep.subr.mxu0 %v559_v0 }
  0x10   :  { %515 = vmatpush3.msra.mxu0 %v39_v8 }
  0x11   :  { %517 = vmatmul.mubr.msk.f32.vlgmr.msra.gmra.mxu0 %vm54_vm1, %v38_v9  ;;  %541 = vmatprep.subr.mxu0 %v559_v0 }
  0x12   :  { %549 = vmatprep.mubr.msk.f32.mxu0 %vm560_vm0, %v559_v0  ;;  %542 = vmatpush3.msra.mxu0 %v469_v38 }
  0x13   :  { %543 = vmatprep.subr.mxu0 %v559_v0 }
  0x14   :  { %544 = vmatpush3.msra.mxu0 %v468_v39 }
  0x15   :  { %545 = vmatprep.subr.mxu0 %v559_v0 }
  0x16   :  { %546 = vmatpush3.msra.mxu0 %v467_v40 }
  0x17   :  { %547 = vmatprep.subr.mxu0 %v559_v0 }
  0x18   :  { %548 = vmatpush3.msra.mxu0 %v466_v41 }
  0xd1   :  { %v124_v11 = vpop.f32.mrf.mxu0 }
  0xd2   :  { %v125_v12 = vadd.f32 %v457_v10, %v124_v11 }
  0xd3   :  { %v518_v13 = vpop.f32.mrf.mxu0 }
  0xd4   :  { %v129_v14 = vsel %vm128_vm2, %v125_v12, 0.0 }
  0xd5   :  { %130 = vadd.xlane.f32.xlu0 %v129_v14 }
 0x15e   :  { %v131_v15 = vpop.xlane.xlu0 %130 }
 0x15f   :  { %v133_v16 = vmul.f32 0.03125, %v131_v15 }
 0x161   :  { %v134_v17 = vsub.f32 %v125_v12, %v133_v16 }
 0x163   :  { %v135_v18 = vmul.f32 %v134_v17, %v134_v17 }
 0x165   :  { %v136_v19 = vsel %vm128_vm2, %v135_v18, 0.0 }
 0x166   :  { %137 = vadd.xlane.f32.xlu0 %v136_v19 }
 0x1ef   :  { %v138_v24 = vpop.xlane.xlu0 %137 }
 0x1f0   :  { %v139_v25 = vmul.f32 0.03125, %v138_v24 }
 0x1f2   :  { %v140_v26 = vadd.f32 1e-05, %v139_v25 }
 0x1f4   :  { %555 = vrsqrt.f32 %v140_v26 }
 0x201   :  { %v556_v27 = vpop.eup %555 }
 0x202   :  { %v142_v29 = vmul.f32 %v556_v27, %v134_v17 }
 0x204   :  { %v150_v31 = vmul.f32 %v459_v28, %v142_v29 }
 0x206   :  { %v158_v32 = vadd.f32 %v460_v30, %v150_v31 }
 0x208   :  { %557 = vtanh.f32 %v158_v32 }
 0x215   :  { %v558_v34 = vpop.eup %557 }
 0x216   :  { %528 = vmatmul.mubr.msk.f32.vlgmr.msra.gmra.mxu1 %vm128_vm2, %v558_v34 }
 0x217   :  { %531 = vmatpush3.msra.mxu1 %v248_v33  ;;  %538 = vmatprep.mubr.msk.f32.mxu1 %vm560_vm0, %v559_v0 }
 0x218   :  { %532 = vmatprep.subr.mxu1 %v559_v0 }
 0x219   :  { %533 = vmatpush3.msra.mxu1 %v247_v35 }
 0x21a   :  { %534 = vmatprep.subr.mxu1 %v559_v0 }
 0x21b   :  { %535 = vmatpush3.msra.mxu1 %v246_v36 }
 0x21c   :  { %536 = vmatprep.subr.mxu1 %v559_v0  ;;  %v475_v0 = vld [vmem:[%s760_s10] ss:$0 sm:$0xff] }
 0x21d   :  { %537 = vmatpush3.msra.mxu1 %v245_v37 }
 0x2d6   :  { %v240_v43 = vpop.f32.mrf.mxu1 }
 0x2d7   :  { %v241_v44 = vadd.f32 %v461_v42, %v240_v43 }
 0x2d8   :  { %v529_v45 = vpop.f32.mrf.mxu1 }
 0x2d9   :  { %v244_v46 = vmax.f32 %v241_v44, 0.0 }
 0x2db   :  { %354 = vrot.lane.b32.xlu1 %v244_v46, %s561_s20  ;;  %539 = vmatmul.mubr.msk.f32.vlgmr.msra.gmra.mxu1 %vm128_vm2, %v244_v46 }
 0x34d   :  { %v355_v47 = vpop.permute.xlu1 %354 }
 0x34e   :  { %550 = vmatmul.mubr.msk.f32.vlgmr.msra.gmra.mxu0 %vm128_vm2, %v355_v47 }
 0x39b   :  { %v325_v49 = vpop.f32.mrf.mxu1 }
 0x39c   :  { %v326_v50 = vadd.f32 %v463_v48, %v325_v49 }
 0x39d   :  { %v540_v51 = vpop.f32.mrf.mxu1 }
 0x39e   :  { %v329_v53 = vmax.f32 %v326_v50, 0.0 }
 0x3a0   :  { %v337_v54 = vmul.f32 %v465_v52, %v329_v53 }
 0x3a2   :  { %v338_v55 = vsel %vm128_vm2, %v337_v54, 0.0 }
 0x3a3   :  { %339 = vadd.xlane.f32.xlu1 %v338_v55 }
 0x40e   :  { %v424_v57 = vpop.f32.mrf.mxu0 }
 0x40f   :  { %v425_v58 = vadd.f32 %v471_v56, %v424_v57 }
 0x410   :  { %v551_v59 = vpop.f32.mrf.mxu0 }
 0x411   :  { %v428_v61 = vmax.f32 %v425_v58, 0.0 }
 0x413   :  { %v437_v62 = vmul.f32 %v474_v60, %v428_v61 }
 0x415   :  { %v438_v63 = vsel %vm128_vm2, %v437_v62, 0.0 }
 0x416   :  { %439 = vadd.xlane.f32.xlu0 %v438_v63 }
 0x42c   :  { %v340_v1 = vpop.xlane.xlu1 %339 }
 0x49f   :  { %v440_v2 = vpop.xlane.xlu0 %439 }
 0x4a0   :  { %v442_v3 = vsel %vm441_vm3, %v340_v1, %v440_v2 }
 0x4a1   :  { %v450_v4 = vadd.f32 %v475_v0, %v442_v3 }
 0x4a3   :  { %452 = vst.msk [vmem:[%s761_s11] sm:$0xff] %vm451_vm4, %v450_v4 }

</bundles_post_ra>
